<compile_context>
chip_gen: v7x
topology: tpu7x:2x2x1
jax: 0.10.0
libtpu: 0.0.40
codegen_flags: <defaults>
</compile_context>

<pallas_src>
import functools
from typing import NamedTuple

import jax
import jax.numpy as jnp
from jax.experimental import pallas as pl
from jax.experimental.pallas import tpu as pltpu


_MAX_TILE_LANES = 4096   # review: raise cap to 2048-8192; 4096 keeps the
                         # f32 intermediates comfortably inside 32 MiB VMEM.


class PINNMeta(NamedTuple):
    in_dim: int
    hidden: int
    num_hidden: int      # number of hidden (tanh) matmul layers = layer_num - 2
    P: int               # padded feature rows (sublane axis), multiple of 128
    groups: int          # samples packed per P-row feature block
    C_pad: int           # packed-input rows (groups*in_dim) padded to mult of 8
    GP: int              # output rows (groups) padded to mult of 8
    compute_dtype: type  # dtype of the hidden-layer MXU inputs
    bf16_act: bool       # keep bias-add + tanh in bf16 (v6e/v7x only)


def _ceil_to(x, m):
    return m * (-(-x // m))


def _cdiv(a, b):
    return -(-a // b)


def _device_kind():
    try:
        return jax.devices()[0].device_kind.lower()
    except Exception:
        return ""


def _num_tensorcores():
    """TensorCores a single Pallas grid can be sharded across (perf only)."""
    kind = _device_kind()
    if any(tag in kind for tag in ("v7", "v4", "v5p")):
        return 2
    return 1


def _supports_bf16_activations():
    """bf16 VPU/EUP path exists on v6e and later; keep f32 acts on v5e."""
    kind = _device_kind()
    return any(tag in kind for tag in ("v6", "v7"))


# --------------------------------------------------------------------------- #
# Kernel
# --------------------------------------------------------------------------- #
def _pinn_kernel(x_ref, w0_ref, wh_ref, wf_ref, b_ref, bf_ref, o_ref, *,
                 num_hidden, compute_dtype, bf16_act):
    """One batch tile of the packed, transposed PINN MLP.

    x_ref : (C_pad, TM)   packed inputs (feature-major rows, samples on lanes)
    w0_ref: (P, C_pad)    layer-0 weights, column d*g+p = feature d of group p
    wh_ref: (Lh, P, P)    hidden-layer W^T, block-diagonal per group
    wf_ref: (GP, P)       final-layer weights, one row per group
    b_ref : (Lh+1, P, 1)  biases for layers 0..Lh, tiled per group
    bf_ref: (GP, 1)       final-layer bias
    o_ref : (GP, TM)      lane-dense outputs; row p holds group p's samples
    """
    # Layer 0: tiny-K (K = C_pad <= 16) matmul from the narrow packed input,
    # kept in f32.  (Review: a VPU broadcast-FMA would shave tens of cycles
    # per step; negligible now that there are only 1-2 grid steps.)
    h = jnp.dot(w0_ref[...], x_ref[...], preferred_element_type=jnp.float32)
    h = jnp.tanh(h + b_ref[0])
    if bf16_act and num_hidden > 0:
        h = h.astype(compute_dtype)

    # Hidden layers: (P,P) @ (P,TM) on the MXU, f32 accumulation.
    for l in range(num_hidden):  # static unroll — layer count is compile time
        acc = jnp.dot(wh_ref[l],
                      h if bf16_act else h.astype(compute_dtype),
                      preferred_element_type=jnp.float32)
        if bf16_act:
            # bf16 bias add + bf16 tanh: halves the dominant VALU/EUP work on
            # v6e/v7x and removes the per-layer f32 round trip.
            h = jnp.tanh(acc.astype(compute_dtype)
                         + b_ref[l + 1].astype(compute_dtype))
        else:
            h = jnp.tanh(acc + b_ref[l + 1])

    # Final 1-output layer kept in f32; output rows are lane-dense.
    o_ref[...] = (jnp.dot(wf_ref[...], h.astype(jnp.float32),
                          preferred_element_type=jnp.float32)
                  + bf_ref[...]).astype(o_ref.dtype)


# --------------------------------------------------------------------------- #
# Parameter / input packing (hoisted out of the per-step path)
# --------------------------------------------------------------------------- #
def pack_pinn_params(weights, biases, *, compute_dtype=jnp.bfloat16,
                     bf16_act=None):
    """One-time repacking of (fan_in, fan_out) weights into the kernel layout."""
    num_layers = len(weights)
    assert num_layers >= 2, "PINN kernel expects at least 2 linear layers"
    in_dim, hidden = weights[0].shape
    assert weights[-1].shape[1] == 1

    if bf16_act is None:
        bf16_act = (jnp.dtype(compute_dtype) == jnp.dtype(jnp.bfloat16)
                    and _supports_bf16_activations())

    P = _ceil_to(max(hidden, in_dim), 128)
    groups = max(1, P // hidden)             # samples packed per P-row block
    C_pad = _ceil_to(groups * in_dim, 8)
    GP = _ceil_to(groups, 8)
    num_hidden = num_layers - 2

    w0 = jnp.zeros((P, C_pad), jnp.float32)
    # num_hidden == 0 still packs a dummy (1,P,P) block (benign; ~64 KiB DMA).
    wh = jnp.zeros((max(1, num_hidden), P, P), jnp.float32)
    wf = jnp.zeros((GP, P), jnp.float32)
    b_stack = jnp.zeros((num_hidden + 1, P, 1), jnp.float32)
    bf = jnp.zeros((GP, 1), jnp.float32)

    for p in range(groups):
        rows = slice(p * hidden, (p + 1) * hidden)
        # layer 0: feature-major columns (d*groups + p) so the host-side input
        # pack is a plain transpose + reshape (no 4-D permutes).
        for d in range(in_dim):
            w0 = w0.at[rows, d * groups + p].set(weights[0][d, :])
        b_stack = b_stack.at[0, rows, 0].set(biases[0])
        # hidden layers: block-diagonal W^T
        for l in range(num_hidden):
            wh = wh.at[l, rows, rows].set(weights[l + 1].T)
            b_stack = b_stack.at[l + 1, rows, 0].set(biases[l + 1])
        # final layer: one output row per group
        wf = wf.at[p, rows].set(weights[-1][:, 0])
        bf = bf.at[p, 0].set(biases[-1][0])

    wh = wh.astype(compute_dtype)   # bf16 halves the weight DMA / VMEM
    meta = PINNMeta(in_dim=in_dim, hidden=hidden, num_hidden=num_hidden,
                    P=P, groups=groups, C_pad=C_pad, GP=GP,
                    compute_dtype=compute_dtype, bf16_act=bool(bf16_act))
    return (w0, wh, wf, b_stack, bf), meta


def pinn_batch_layout(n, meta):
    """(tile_m, grid_m): as few grid steps as possible, generation aware."""
    lanes_needed = max(1, _cdiv(n, meta.groups))
    ncores = _num_tensorcores()
    if ncores >= 2 and lanes_needed > 128:
        # Even split so both TensorCores get work (v7x / megacore).
        tile_m = min(_ceil_to(_cdiv(lanes_needed, ncores), 128),
                     _MAX_TILE_LANES)
        grid_m = _ceil_to(max(ncores, _cdiv(lanes_needed, tile_m)), ncores)
    else:
        # Single TensorCore (v5e/v6e) or tiny batch: one grid step if it fits.
        tile_m = min(_ceil_to(lanes_needed, 128), _MAX_TILE_LANES)
        grid_m = max(1, _cdiv(lanes_needed, tile_m))
    return tile_m, grid_m


def pack_pinn_inputs(x, meta, n_lanes):
    """Pack (n, in_dim) inputs into the (C_pad, n_lanes) kernel slab.

    Sample s = p*n_lanes + j  ->  group p, lane j.  Pure transpose + reshape.
    Cacheable across training iterations when collocation points are reused.
    """
    n, in_dim = x.shape
    g = meta.groups
    xT = jnp.zeros((in_dim, g * n_lanes), jnp.float32).at[:, :n].set(
        x.T.astype(jnp.float32))
    x_pk = xT.reshape(in_dim * g, n_lanes)
    if meta.C_pad > in_dim * g:
        x_pk = jnp.pad(x_pk, ((0, meta.C_pad - in_dim * g), (0, 0)))
    return x_pk


def pinn_apply_packed(x_pk, packed, meta, tile_m):
    """Run the Pallas kernel on a pre-packed (C_pad, n_lanes) input slab."""
    w0, wh, wf, b_stack, bf = packed
    n_lanes = x_pk.shape[1]
    grid_m = n_lanes // tile_m

    kernel = functools.partial(_pinn_kernel, num_hidden=meta.num_hidden,
                               compute_dtype=meta.compute_dtype,
                               bf16_act=meta.bf16_act)

    return pl.pallas_call(
        kernel,
        out_shape=jax.ShapeDtypeStruct((meta.GP, n_lanes), jnp.float32),
        grid_spec=pltpu.PrefetchScalarGridSpec(
            num_scalar_prefetch=0,
            grid=(grid_m,),
            in_specs=[
                # packed input: only the lane block for this grid step is DMA'd
                pl.BlockSpec((meta.C_pad, tile_m), lambda i: (0, i)),
                # Parameters are grid-invariant (constant index_map): Pallas
                # does not re-fetch blocks whose indices do not change and the
                # whole parameter stack is only a few hundred KiB.
                pl.BlockSpec((meta.P, meta.C_pad), lambda i: (0, 0)),
                pl.BlockSpec((wh.shape[0], meta.P, meta.P),
                             lambda i: (0, 0, 0)),
                pl.BlockSpec((meta.GP, meta.P), lambda i: (0, 0)),
                pl.BlockSpec((b_stack.shape[0], meta.P, 1),
                             lambda i: (0, 0, 0)),
                pl.BlockSpec((meta.GP, 1), lambda i: (0, 0)),
            ],
            out_specs=pl.BlockSpec((meta.GP, tile_m), lambda i: (0, i)),
        ),
        compiler_params=pltpu.CompilerParams(
            dimension_semantics=("parallel",),
            vmem_limit_bytes=32 * 1024 * 1024),
    )(x_pk, w0, wh, wf, b_stack, bf)


def pinn_forward_pallas(x, packed, meta):
    """PINN forward.  x: (n, in_dim) float32.  Returns (n, 1) float32."""
    n, in_dim = x.shape
    assert in_dim == meta.in_dim
    tile_m, grid_m = pinn_batch_layout(n, meta)
    n_lanes = tile_m * grid_m

    x_pk = pack_pinn_inputs(x, meta, n_lanes)
    out = pinn_apply_packed(x_pk, packed, meta, tile_m)

    # Unpack: sample s lives at out[s // n_lanes, s % n_lanes] -> pure reshape.
    y = out[:meta.groups].reshape(meta.groups * n_lanes)[:n].reshape(n, 1)
    return y


# --------------------------------------------------------------------------- #
# Init + pure-JAX reference (mirrors the PyTorch forward)
# --------------------------------------------------------------------------- #
def init_pinn_params(key, neuron_num, layer_num, dim=1, param_num=2,
                     zero_shot=False):
    """Deterministic PyTorch-Linear-style init (uniform(+-1/sqrt(fan_in)))."""
    in_dim = dim + param_num if zero_shot else dim
    dims = []
    for i in range(layer_num):
        if i == 0:
            dims.append((in_dim, neuron_num))
        elif i == layer_num - 1:
            dims.append((neuron_num, 1))
        else:
            dims.append((neuron_num, neuron_num))
    weights, biases = [], []
    for (fan_in, fan_out) in dims:
        key, kw, kb = jax.random.split(key, 3)
        bound = 1.0 / jnp.sqrt(jnp.float32(fan_in))
        # stored as (fan_in, fan_out) so forward is x @ W + b
        weights.append(jax.random.uniform(kw, (fan_in, fan_out), jnp.float32,
                                          -bound, bound))
        biases.append(jax.random.uniform(kb, (fan_out,), jnp.float32,
                                         -bound, bound))
    return weights, biases


def pinn_forward_ref(x, weights, biases, compute_dtype=jnp.float32,
                     bf16_act=False):
    """Plain-JAX reference mirroring the kernel's precision choices."""
    num_layers = len(weights)
    h = jnp.dot(x.astype(jnp.float32), weights[0],
                preferred_element_type=jnp.float32) + biases[0]
    h = jnp.tanh(h)
    if bf16_act and num_layers > 2:
        h = h.astype(compute_dtype)
    for l in range(1, num_layers - 1):
        acc = jnp.dot(h.astype(compute_dtype), weights[l].astype(compute_dtype),
                      preferred_element_type=jnp.float32)
        if bf16_act:
            h = jnp.tanh(acc.astype(compute_dtype)
                         + biases[l].astype(compute_dtype))
        else:
            h = jnp.tanh(acc + biases[l])
    return jnp.dot(h.astype(jnp.float32), weights[-1],
                   preferred_element_type=jnp.float32) + biases[-1]


if __name__ == "__main__":
    key = jax.random.PRNGKey(0)

    configs = [
        # (neuron_num, layer_num, dim, param_num, zero_shot, batch)
        (32, 4, 1, 2, False, 1000),   # 1-D PINN:      input (n, 1)
        (32, 5, 2, 1, True, 300),     # zero-shot PINN: input (n, dim+param_num) = (n, 3)
    ]

    fwd = jax.jit(pinn_forward_pallas, static_argnums=2)

    for (neuron_num, layer_num, dim, param_num, zero_shot, batch) in configs:
        in_dim = dim + param_num if zero_shot else dim
        key, kx, kp = jax.random.split(key, 3)
        x = jax.random.uniform(kx, (batch, in_dim), jnp.float32, -1.0, 1.0)
        weights, biases = init_pinn_params(kp, neuron_num, layer_num,
                                           dim=dim, param_num=param_num,
                                           zero_shot=zero_shot)

        # (compute_dtype, tol vs matched-precision ref, tol vs pure-f32 ref)
        for compute_dtype, tol_matched, tol_f32 in (
                (jnp.float32, 1e-4, 1e-4),
                (jnp.bfloat16, 5e-2, 2e-1)):
            packed, meta = pack_pinn_params(weights, biases,
                                            compute_dtype=compute_dtype)
            out = jax.block_until_ready(fwd(x, packed, meta))
            assert out.shape == (batch, 1), out.shape

            ref_matched = pinn_forward_ref(x, weights, biases,
                                           compute_dtype, meta.bf16_act)
            ref_f32 = pinn_forward_ref(x, weights, biases, jnp.float32, False)
            err_matched = float(jnp.max(jnp.abs(out - ref_matched)))
            err_f32 = float(jnp.max(jnp.abs(out - ref_f32)))
            assert err_matched < tol_matched, (str(compute_dtype), err_matched)
            assert err_f32 < tol_f32, (str(compute_dtype), err_f32)

    print("KERNEL_OK")
</pallas_src>

<mosaic_0001>
module attributes {stable_mosaic.version = 11 : i64} {
  func.func @_pinn_kernel(%arg0: i32, %arg1: memref<8x256xf32, #tpu.memory_space<vmem>>, %arg2: memref<128x8xf32, #tpu.memory_space<vmem>>, %arg3: memref<2x128x128xf32, #tpu.memory_space<vmem>>, %arg4: memref<8x128xf32, #tpu.memory_space<vmem>>, %arg5: memref<3x128x1xf32, #tpu.memory_space<vmem>>, %arg6: memref<8x1xf32, #tpu.memory_space<vmem>>, %arg7: memref<8x256xf32, #tpu.memory_space<vmem>>) attributes {dimension_semantics = [#tpu.dimension_semantics<parallel>], iteration_bounds = array<i64: 1>, scalar_prefetch = 0 : i64, scratch_operands = 0 : i64, tpu.core_type = #tpu.core_type<tc>, window_params = [{transform_indices = @transform_0, window_bounds = array<i64: 8, 256>}, {pipeline_mode = #tpu.pipeline_mode<synchronous>, transform_indices = @transform_1, window_bounds = array<i64: 128, 8>}, {pipeline_mode = #tpu.pipeline_mode<synchronous>, transform_indices = @transform_2, window_bounds = array<i64: 2, 128, 128>}, {pipeline_mode = #tpu.pipeline_mode<synchronous>, transform_indices = @transform_3, window_bounds = array<i64: 8, 128>}, {pipeline_mode = #tpu.pipeline_mode<synchronous>, transform_indices = @transform_4, window_bounds = array<i64: 3, 128, 1>}, {pipeline_mode = #tpu.pipeline_mode<synchronous>, transform_indices = @transform_5, window_bounds = array<i64: 8, 1>}, {transform_indices = @transform_6, window_bounds = array<i64: 8, 256>}]} {
    %c0 = arith.constant 0 : index
    %c0_0 = arith.constant 0 : index
    %0 = vector.load %arg2[%c0, %c0_0] : memref<128x8xf32, #tpu.memory_space<vmem>>, vector<128x8xf32>
    %c0_1 = arith.constant 0 : index
    %c0_2 = arith.constant 0 : index
    %1 = vector.load %arg1[%c0_1, %c0_2] : memref<8x256xf32, #tpu.memory_space<vmem>>, vector<8x256xf32>
    %cst = arith.constant dense<0.000000e+00> : vector<128x256xf32>
    %2 = tpu.matmul %0, %1, %cst {dimension_numbers = #tpu.dot_dimension_numbers<[1], [0], [0], [1], [0, 0, 1, 1], [], []>} : vector<128x8xf32>, vector<8x256xf32>, vector<128x256xf32> -> vector<128x256xf32>
    %c0_3 = arith.constant 0 : index
    %c0_4 = arith.constant 0 : index
    %c0_5 = arith.constant 0 : index
    %3 = vector.load %arg5[%c0_3, %c0_4, %c0_5] : memref<3x128x1xf32, #tpu.memory_space<vmem>>, vector<1x128x1xf32>
    %4 = vector.shape_cast %3 : vector<1x128x1xf32> to vector<128x1xf32>
    %5 = vector.broadcast %4 : vector<128x1xf32> to vector<128x256xf32>
    %6 = arith.addf %2, %5 : vector<128x256xf32>
    %7 = math.tanh %6 : vector<128x256xf32>
    %c0_6 = arith.constant 0 : index
    %c0_7 = arith.constant 0 : index
    %c0_8 = arith.constant 0 : index
    %8 = vector.load %arg3[%c0_6, %c0_7, %c0_8] : memref<2x128x128xf32, #tpu.memory_space<vmem>>, vector<1x128x128xf32>
    %9 = vector.shape_cast %8 : vector<1x128x128xf32> to vector<128x128xf32>
    %cst_9 = arith.constant dense<0.000000e+00> : vector<128x256xf32>
    %10 = tpu.matmul %9, %7, %cst_9 {dimension_numbers = #tpu.dot_dimension_numbers<[1], [0], [0], [1], [0, 0, 1, 1], [], []>} : vector<128x128xf32>, vector<128x256xf32>, vector<128x256xf32> -> vector<128x256xf32>
    %c1 = arith.constant 1 : index
    %c0_10 = arith.constant 0 : index
    %c0_11 = arith.constant 0 : index
    %11 = vector.load %arg5[%c1, %c0_10, %c0_11] : memref<3x128x1xf32, #tpu.memory_space<vmem>>, vector<1x128x1xf32>
    %12 = vector.shape_cast %11 : vector<1x128x1xf32> to vector<128x1xf32>
    %13 = vector.broadcast %12 : vector<128x1xf32> to vector<128x256xf32>
    %14 = arith.addf %10, %13 : vector<128x256xf32>
    %15 = math.tanh %14 : vector<128x256xf32>
    %c1_12 = arith.constant 1 : index
    %c0_13 = arith.constant 0 : index
    %c0_14 = arith.constant 0 : index
    %16 = vector.load %arg3[%c1_12, %c0_13, %c0_14] : memref<2x128x128xf32, #tpu.memory_space<vmem>>, vector<1x128x128xf32>
    %17 = vector.shape_cast %16 : vector<1x128x128xf32> to vector<128x128xf32>
    %cst_15 = arith.constant dense<0.000000e+00> : vector<128x256xf32>
    %18 = tpu.matmul %17, %15, %cst_15 {dimension_numbers = #tpu.dot_dimension_numbers<[1], [0], [0], [1], [0, 0, 1, 1], [], []>} : vector<128x128xf32>, vector<128x256xf32>, vector<128x256xf32> -> vector<128x256xf32>
    %c2 = arith.constant 2 : index
    %c0_16 = arith.constant 0 : index
    %c0_17 = arith.constant 0 : index
    %19 = vector.load %arg5[%c2, %c0_16, %c0_17] : memref<3x128x1xf32, #tpu.memory_space<vmem>>, vector<1x128x1xf32>
    %20 = vector.shape_cast %19 : vector<1x128x1xf32> to vector<128x1xf32>
    %21 = vector.broadcast %20 : vector<128x1xf32> to vector<128x256xf32>
    %22 = arith.addf %18, %21 : vector<128x256xf32>
    %23 = math.tanh %22 : vector<128x256xf32>
    %c0_18 = arith.constant 0 : index
    %c0_19 = arith.constant 0 : index
    %24 = vector.load %arg4[%c0_18, %c0_19] : memref<8x128xf32, #tpu.memory_space<vmem>>, vector<8x128xf32>
    %cst_20 = arith.constant dense<0.000000e+00> : vector<8x256xf32>
    %25 = tpu.matmul %24, %23, %cst_20 {dimension_numbers = #tpu.dot_dimension_numbers<[1], [0], [0], [1], [0, 0, 1, 1], [], []>} : vector<8x128xf32>, vector<128x256xf32>, vector<8x256xf32> -> vector<8x256xf32>
    %c0_21 = arith.constant 0 : index
    %c0_22 = arith.constant 0 : index
    %26 = vector.load %arg6[%c0_21, %c0_22] : memref<8x1xf32, #tpu.memory_space<vmem>>, vector<8x1xf32>
    %27 = vector.broadcast %26 : vector<8x1xf32> to vector<8x256xf32>
    %28 = arith.addf %25, %27 : vector<8x256xf32>
    %c0_23 = arith.constant 0 : index
    %c0_24 = arith.constant 0 : index
    %29 = vector.load %arg7[%c0_23, %c0_24] : memref<8x256xf32, #tpu.memory_space<vmem>>, vector<8x256xf32>
    tpu.vector_store %arg7[%c0_23, %c0_24], %28 {strides = array<i32>} : memref<8x256xf32, #tpu.memory_space<vmem>>, vector<8x256xf32>,
    return
  }
  func.func @transform_0(%arg0: i32) -> (i32, i32) {
    %c0_i32 = arith.constant 0 : i32
    %c0_i32_0 = arith.constant 0 : i32
    return %c0_i32, %arg0 : i32, i32
  }
  func.func @transform_1(%arg0: i32) -> (i32, i32) {
    %c0_i32 = arith.constant 0 : i32
    %c0_i32_0 = arith.constant 0 : i32
    %c0_i32_1 = arith.constant 0 : i32
    return %c0_i32, %c0_i32_0 : i32, i32
  }
  func.func @transform_2(%arg0: i32) -> (i32, i32, i32) {
    %c0_i32 = arith.constant 0 : i32
    %c0_i32_0 = arith.constant 0 : i32
    %c0_i32_1 = arith.constant 0 : i32
    %c0_i32_2 = arith.constant 0 : i32
    return %c0_i32, %c0_i32_0, %c0_i32_1 : i32, i32, i32
  }
  func.func @transform_3(%arg0: i32) -> (i32, i32) {
    %c0_i32 = arith.constant 0 : i32
    %c0_i32_0 = arith.constant 0 : i32
    %c0_i32_1 = arith.constant 0 : i32
    return %c0_i32, %c0_i32_0 : i32, i32
  }
  func.func @transform_4(%arg0: i32) -> (i32, i32, i32) {
    %c0_i32 = arith.constant 0 : i32
    %c0_i32_0 = arith.constant 0 : i32
    %c0_i32_1 = arith.constant 0 : i32
    %c0_i32_2 = arith.constant 0 : i32
    return %c0_i32, %c0_i32_0, %c0_i32_1 : i32, i32, i32
  }
  func.func @transform_5(%arg0: i32) -> (i32, i32) {
    %c0_i32 = arith.constant 0 : i32
    %c0_i32_0 = arith.constant 0 : i32
    %c0_i32_1 = arith.constant 0 : i32
    return %c0_i32, %c0_i32_0 : i32, i32
  }
  func.func @transform_6(%arg0: i32) -> (i32, i32) {
    %c0_i32 = arith.constant 0 : i32
    %c0_i32_0 = arith.constant 0 : i32
    return %c0_i32, %arg0 : i32, i32
  }
}

</mosaic_0001>

<bundles_post_ra>
// kernel: pinn_forward_pallas.1
= control target key start
LH: loop header
LB: loop body
LE: loop exit
PB: predicated region body
PF: predicated region fallthrough
CT: control target
= control target key end

     0   :  { %v1434_v2 = vmov 0.0   ;;  %vm137_vm0 = vcmask 64512   ;;  %v1435_v6 = vmov 0   ;;  %s1882_s0 = inlined_call_operand.vmem [shape: f32[8,256], index: 0, kind: input, shape index: {}]   ;;  %s1883_s1 = inlined_call_operand.vmem [shape: f32[128,8], index: 1, kind: input, shape index: {}]   ;;  %s1884_s4 = inlined_call_operand.vmem [shape: f32[3,128,1], index: 4, kind: input, shape index: {}]   ;;  %s1885_s5 = inlined_call_operand.vmem [shape: f32[8,1], index: 5, kind: input, shape index: {}]   ;;  %s1886_s2 = inlined_call_operand.vmem [shape: f32[2,128,128], index: 2, kind: input, shape index: {}]   ;;  %s1887_s3 = inlined_call_operand.vmem [shape: f32[8,128], index: 3, kind: input, shape index: {}]   ;;  %s1888_s6 = inlined_call_operand.vmem [shape: f32[8,256], index: 6, kind: output, shape index: {}]  }
   0x1   :  { %v40_v0 = vld [vmem:[%s1882_s0 + $0x8] sm:$0xff]  ;;  %v39_v1 = vld [vmem:[%s1882_s0] sm:$0xff]  ;;  %250 = vmatprep.mubr.f32.mxu0 %v1434_v2  ;;  %298 = vmatprep.mubr.f32.mxu1 %v1434_v2  ;;  %v43_v8 = vld [vmem:[%s1884_s4 + $0x10] sm:$0xff] }
   0x2   :  { %v23_v3 = vld [vmem:[%s1883_s1] sm:$0xff]  ;;  %186 = vmatprep.subr.mxu0 %v40_v0  ;;  %1236 = vmatprep.subr.mxu1 %v40_v0  ;;  %v24_v7 = vld [vmem:[%s1883_s1 + $0x8] sm:$0xff]  ;;  %v25_v11 = vld [vmem:[%s1883_s1 + $0x10] sm:$0xff] }
   0x3   :  { %v31_v4 = vld [vmem:[%s1883_s1 + $0x40] sm:$0xff]  ;;  %187 = vmatpush1.msra.mxu0 %v39_v1  ;;  %1237 = vmatpush1.msra.mxu1 %v39_v1  ;;  %v32_v9 = vld [vmem:[%s1883_s1 + $0x48] sm:$0xff]  ;;  %v44_v12 = vld [vmem:[%s1884_s4 + $0x18] sm:$0xff] }
   0x4   :  { %v41_v5 = vld [vmem:[%s1884_s4] sm:$0xff]  ;;  %1240 = vset.pattern.permute.xlu0 %v1435_v6  ;;  %1076 = vmatmul.mubr.msk.f32.vlgmr.msra.gmra.mrb[0].mxu0 %vm137_vm0, %v23_v3  ;;  %v42_v10 = vld [vmem:[%s1884_s4 + $0x8] sm:$0xff]  ;;  %v33_v13 = vld [vmem:[%s1883_s1 + $0x50] sm:$0xff] }
   0x5   :  { %1084 = vmatmul.mubr.msk.f32.vlgmr.msra.gmra.mrb[0].mxu1 %vm137_vm0, %v31_v4  ;;  %59 = vperm.xlu0 %1240, %v41_v5   ;;  %v45_v14 = vld [vmem:[%s1884_s4 + $0x20] sm:$0xff]  ;;  %v26_v15 = vld [vmem:[%s1883_s1 + $0x18] sm:$0xff]  ;;  %v46_v16 = vld [vmem:[%s1884_s4 + $0x28] sm:$0xff] }
   0x6   :  { %256 = vmatprep.mubr.f32.mxu0 %v1434_v2  ;;  %304 = vmatprep.mubr.f32.mxu1 %v1434_v2  ;;  %v34_v17 = vld [vmem:[%s1883_s1 + $0x58] sm:$0xff]  ;;  %v47_v18 = vld [vmem:[%s1884_s4 + $0x30] sm:$0xff]  ;;  %v27_v19 = vld [vmem:[%s1883_s1 + $0x20] sm:$0xff] }
   0x7   :  { %1241 = vset.pattern.permute.xlu1 %v1435_v6  ;;  %v48_v20 = vld [vmem:[%s1884_s4 + $0x38] sm:$0xff]  ;;  %v35_v21 = vld [vmem:[%s1883_s1 + $0x60] sm:$0xff]  ;;  %v28_v23 = vld [vmem:[%s1883_s1 + $0x28] sm:$0xff] }
   0x8   :  { %1077 = vmatmul.mubr.msk.f32.gmra.mrb[2].mxu0 %vm137_vm0, %v24_v7  ;;  %69 = vperm.xlu1 %1241, %v43_v8   ;;  %v49_v22 = vld [vmem:[%s1884_s4 + $0x40] sm:$0xff]  ;;  %v50_v24 = vld [vmem:[%s1884_s4 + $0x48] sm:$0xff]  ;;  %v51_v26 = vld [vmem:[%s1884_s4 + $0x50] sm:$0xff] }
   0x9   :  { %1085 = vmatmul.mubr.msk.f32.gmra.mrb[2].mxu1 %vm137_vm0, %v32_v9  ;;  %64 = vperm.xlu0 %1240, %v42_v10   ;;  %v36_v25 = vld [vmem:[%s1883_s1 + $0x68] sm:$0xff]  ;;  %v29_v27 = vld [vmem:[%s1883_s1 + $0x30] sm:$0xff]  ;;  %v52_v28 = vld [vmem:[%s1884_s4 + $0x58] sm:$0xff] }
   0xa   :  { %262 = vmatprep.mubr.f32.mxu0 %v1434_v2  ;;  %310 = vmatprep.mubr.f32.mxu1 %v1434_v2  ;;  %v37_v29 = vld [vmem:[%s1883_s1 + $0x70] sm:$0xff]  ;;  %v53_v30 = vld [vmem:[%s1884_s4 + $0x60] sm:$0xff]  ;;  %v30_v31 = vld [vmem:[%s1883_s1 + $0x38] sm:$0xff] }
   0xb   :  { %v54_v32 = vld [vmem:[%s1884_s4 + $0x68] sm:$0xff]  ;;  %v38_v33 = vld [vmem:[%s1883_s1 + $0x78] sm:$0xff]  ;;  %v55_v34 = vld [vmem:[%s1884_s4 + $0x70] sm:$0xff] }
   0xc   :  { %1078 = vmatmul.mubr.msk.f32.gmra.mrb[4].mxu0 %vm137_vm0, %v25_v11  ;;  %74 = vperm.xlu1 %1241, %v44_v12   ;;  %v56_v35 = vld [vmem:[%s1884_s4 + $0x78] sm:$0xff]  ;;  %v1092_v36 = vld [vmem:[%s1884_s4 + $0x80] sm:$0xff]  ;;  %v1093_v37 = vld [vmem:[%s1884_s4 + $0x88] sm:$0xff] }
   0xd   :  { %1086 = vmatmul.mubr.msk.f32.gmra.mrb[4].mxu1 %vm137_vm0, %v33_v13  ;;  %79 = vperm.xlu0 %1240, %v45_v14   ;;  %v1094_v38 = vld [vmem:[%s1884_s4 + $0x90] sm:$0xff]  ;;  %v1095_v39 = vld [vmem:[%s1884_s4 + $0x98] sm:$0xff]  ;;  %v1096_v40 = vld [vmem:[%s1884_s4 + $0xa0] sm:$0xff] }
   0xe   :  { %268 = vmatprep.mubr.f32.mxu0 %v1434_v2  ;;  %316 = vmatprep.mubr.f32.mxu1 %v1434_v2  ;;  %v1097_v41 = vld [vmem:[%s1884_s4 + $0xa8] sm:$0xff]  ;;  %v1098_v42 = vld [vmem:[%s1884_s4 + $0xb0] sm:$0xff]  ;;  %v1099_v43 = vld [vmem:[%s1884_s4 + $0xb8] sm:$0xff] }
   0xf   :  { %v1100_v44 = vld [vmem:[%s1884_s4 + $0xc0] sm:$0xff]  ;;  %v1101_v45 = vld [vmem:[%s1884_s4 + $0xc8] sm:$0xff]  ;;  %v1102_v46 = vld [vmem:[%s1884_s4 + $0xd0] sm:$0xff] }
  0x10   :  { %1079 = vmatmul.mubr.msk.f32.gmra.mrb[6].mxu0 %vm137_vm0, %v26_v15  ;;  %84 = vperm.xlu1 %1241, %v46_v16   ;;  %v1103_v47 = vld [vmem:[%s1884_s4 + $0xd8] sm:$0xff]  ;;  %v1104_v48 = vld [vmem:[%s1884_s4 + $0xe0] sm:$0xff]  ;;  %v1105_v49 = vld [vmem:[%s1884_s4 + $0xe8] sm:$0xff] }
  0x11   :  { %1087 = vmatmul.mubr.msk.f32.gmra.mrb[6].mxu1 %vm137_vm0, %v34_v17  ;;  %89 = vperm.xlu0 %1240, %v47_v18   ;;  %v1106_v50 = vld [vmem:[%s1884_s4 + $0xf0] sm:$0xff]  ;;  %v1107_v51 = vld [vmem:[%s1884_s4 + $0xf8] sm:$0xff]  ;;  %v1124_v52 = vld [vmem:[%s1884_s4 + $0x100] sm:$0xff] }
  0x12   :  { %274 = vmatprep.mubr.f32.mxu0 %v1434_v2  ;;  %322 = vmatprep.mubr.f32.mxu1 %v1434_v2  ;;  %v1125_v53 = vld [vmem:[%s1884_s4 + $0x108] sm:$0xff]  ;;  %v1126_v54 = vld [vmem:[%s1884_s4 + $0x110] sm:$0xff]  ;;  %v1127_v55 = vld [vmem:[%s1884_s4 + $0x118] sm:$0xff] }
  0x13   :  { %v1128_v56 = vld [vmem:[%s1884_s4 + $0x120] sm:$0xff]  ;;  %v1129_v57 = vld [vmem:[%s1884_s4 + $0x128] sm:$0xff]  ;;  %v1130_v58 = vld [vmem:[%s1884_s4 + $0x130] sm:$0xff] }
  0x14   :  { %1080 = vmatmul.mubr.msk.f32.gmra.mrb[8].mxu0 %vm137_vm0, %v27_v19  ;;  %94 = vperm.xlu1 %1241, %v48_v20   ;;  %v1131_v59 = vld [vmem:[%s1884_s4 + $0x138] sm:$0xff]  ;;  %v1132_v60 = vld [vmem:[%s1884_s4 + $0x140] sm:$0xff]  ;;  %v1133_v61 = vld [vmem:[%s1884_s4 + $0x148] sm:$0xff] }
  0x15   :  { %1088 = vmatmul.mubr.msk.f32.gmra.mrb[8].mxu1 %vm137_vm0, %v35_v21  ;;  %99 = vperm.xlu0 %1240, %v49_v22   ;;  %v1134_v62 = vld [vmem:[%s1884_s4 + $0x150] sm:$0xff]  ;;  %v1135_v63 = vld [vmem:[%s1884_s4 + $0x158] sm:$0xff]  ;;  %v1136_v0 = vld [vmem:[%s1884_s4 + $0x160] sm:$0xff] }
  0x16   :  { %280 = vmatprep.mubr.f32.mxu0 %v1434_v2  ;;  %328 = vmatprep.mubr.f32.mxu1 %v1434_v2  ;;  %v1137_v1 = vld [vmem:[%s1884_s4 + $0x168] sm:$0xff]  ;;  %v1138_v3 = vld [vmem:[%s1884_s4 + $0x170] sm:$0xff]  ;;  %v1139_v4 = vld [vmem:[%s1884_s4 + $0x178] sm:$0xff] }
  0x17   :  { %v993_v5 = vld [vmem:[%s1885_s5] sm:$0xff] }
  0x18   :  { %1081 = vmatmul.mubr.msk.f32.gmra.mrb[10].mxu0 %vm137_vm0, %v28_v23  ;;  %104 = vperm.xlu1 %1241, %v50_v24  }
  0x19   :  { %1089 = vmatmul.mubr.msk.f32.gmra.mrb[10].mxu1 %vm137_vm0, %v36_v25  ;;  %109 = vperm.xlu0 %1240, %v51_v26  }
  0x1a   :  { %286 = vmatprep.mubr.f32.mxu0 %v1434_v2  ;;  %334 = vmatprep.mubr.f32.mxu1 %v1434_v2 }
  0x1c   :  { %1082 = vmatmul.mubr.msk.f32.gmra.mrb[12].mxu0 %vm137_vm0, %v29_v27  ;;  %114 = vperm.xlu1 %1241, %v52_v28  }
  0x1d   :  { %1090 = vmatmul.mubr.msk.f32.gmra.mrb[12].mxu1 %vm137_vm0, %v37_v29  ;;  %119 = vperm.xlu0 %1240, %v53_v30  }
  0x1e   :  { %292 = vmatprep.mubr.f32.mxu0 %v1434_v2  ;;  %340 = vmatprep.mubr.f32.mxu1 %v1434_v2 }
  0x20   :  { %1083 = vmatmul.mubr.msk.f32.gmra.mrb[14].mxu0 %vm137_vm0, %v30_v31  ;;  %124 = vperm.xlu1 %1241, %v54_v32  }
  0x21   :  { %1091 = vmatmul.mubr.msk.f32.gmra.mrb[14].mxu1 %vm137_vm0, %v38_v33  ;;  %129 = vperm.xlu0 %1240, %v55_v34  }
  0x22   :  { %556 = vmatprep.mubr.f32.mxu1 %v1434_v2  ;;  %863 = vmatprep.mubr.f32.mxu0 %v1434_v2 }
  0x24   :  { %134 = vperm.xlu1 %1241, %v56_v35  }
  0x25   :  { %414 = vperm.xlu0 %1240, %v1092_v36  }
  0x28   :  { %419 = vperm.xlu1 %1241, %v1093_v37  }
  0x29   :  { %424 = vperm.xlu0 %1240, %v1094_v38  }
  0x2c   :  { %429 = vperm.xlu1 %1241, %v1095_v39  }
  0x2d   :  { %434 = vperm.xlu0 %1240, %v1096_v40  }
  0x30   :  { %439 = vperm.xlu1 %1241, %v1097_v41  }
  0x31   :  { %444 = vperm.xlu0 %1240, %v1098_v42  }
  0x34   :  { %449 = vperm.xlu1 %1241, %v1099_v43  }
  0x35   :  { %454 = vperm.xlu0 %1240, %v1100_v44  }
  0x38   :  { %459 = vperm.xlu1 %1241, %v1101_v45  }
  0x39   :  { %464 = vperm.xlu0 %1240, %v1102_v46  }
  0x3c   :  { %469 = vperm.xlu1 %1241, %v1103_v47  }
  0x3d   :  { %474 = vperm.xlu0 %1240, %v1104_v48  }
  0x40   :  { %479 = vperm.xlu1 %1241, %v1105_v49  }
  0x41   :  { %484 = vperm.xlu0 %1240, %v1106_v50  }
  0x44   :  { %489 = vperm.xlu1 %1241, %v1107_v51  }
  0x45   :  { %721 = vperm.xlu0 %1240, %v1124_v52  }
  0x48   :  { %726 = vperm.xlu1 %1241, %v1125_v53  }
  0x49   :  { %731 = vperm.xlu0 %1240, %v1126_v54  }
  0x4c   :  { %736 = vperm.xlu1 %1241, %v1127_v55  }
  0x4d   :  { %741 = vperm.xlu0 %1240, %v1128_v56  }
  0x50   :  { %746 = vperm.xlu1 %1241, %v1129_v57  }
  0x51   :  { %751 = vperm.xlu0 %1240, %v1130_v58  }
  0x54   :  { %756 = vperm.xlu1 %1241, %v1131_v59  }
  0x55   :  { %761 = vperm.xlu0 %1240, %v1132_v60  }
  0x58   :  { %766 = vperm.xlu1 %1241, %v1133_v61  }
  0x59   :  { %771 = vperm.xlu0 %1240, %v1134_v62  }
  0x5c   :  { %776 = vperm.xlu1 %1241, %v1135_v63  }
  0x5d   :  { %781 = vperm.xlu0 %1240, %v1136_v0  }
  0x60   :  { %786 = vperm.xlu1 %1241, %v1137_v1  }
  0x61   :  { %791 = vperm.xlu0 %1240, %v1138_v3  }
  0x64   :  { %796 = vperm.xlu1 %1241, %v1139_v4  }
  0x65   :  { %996 = vperm.xlu0 %1240, %v993_v5  }
  0x84   :  { %v60_v6 = vpop.permute.xlu0 %59 }
  0x87   :  { %v70_v7 = vpop.permute.xlu1 %69 }
  0x88   :  { %v65_v8 = vpop.permute.xlu0 %64 }
  0x8b   :  { %v75_v9 = vpop.permute.xlu1 %74 }
  0x8c   :  { %v1706_v10 = vpop.permute.xlu0 %79 }
  0x8f   :  { %v1708_v11 = vpop.permute.xlu1 %84 }
  0x90   :  { %v1710_v12 = vpop.permute.xlu0 %89 }
  0x93   :  { %v1712_v13 = vpop.permute.xlu1 %94 }
  0x94   :  { %v100_v17 = vpop.permute.xlu0 %99 }
  0x97   :  { %v105_v26 = vpop.permute.xlu1 %104 }
  0x98   :  { %v110_v35 = vpop.permute.xlu0 %109 }
  0x9b   :  { %v115_v43 = vpop.permute.xlu1 %114 }
  0x9c   :  { %v120_v54 = vpop.permute.xlu0 %119 }
  0xd7   :  { %v252_v14 = vpop.f32.mrb[0].mxu0 }
  0xd8   :  { %v253_v15 = vadd.f32 %v252_v14, %v60_v6  ;;  %v254_v16 = vpop.f32.mrb[1].mxu0  ;;  %v300_v19 = vpop.f32.mrb[0].mxu1 }
  0xd9   :  { %v255_v18 = vadd.f32 %v254_v16, %v60_v6  ;;  %v301_v20 = vadd.f32 %v300_v19, %v100_v17  ;;  %v302_v21 = vpop.f32.mrb[1].mxu1  ;;  %v125_v6 = vpop.permute.xlu1 %124 }
  0xda   :  { %1242 = vtanh.f32 %v253_v15  ;;  %v303_v23 = vadd.f32 %v302_v21, %v100_v17 }
  0xdb   :  { %1244 = vtanh.f32 %v255_v18  ;;  %v258_v22 = vpop.f32.mrb[2].mxu0 }
  0xdc   :  { %v259_v24 = vadd.f32 %v258_v22, %v65_v8  ;;  %v260_v25 = vpop.f32.mrb[3].mxu0  ;;  %1246 = vtanh.f32 %v301_v20  ;;  %v306_v28 = vpop.f32.mrb[2].mxu1 }
  0xdd   :  { %v261_v27 = vadd.f32 %v260_v25, %v65_v8  ;;  %1248 = vtanh.f32 %v303_v23  ;;  %v307_v29 = vadd.f32 %v306_v28, %v105_v26  ;;  %v308_v30 = vpop.f32.mrb[3].mxu1 }
  0xde   :  { %1250 = vtanh.f32 %v259_v24  ;;  %v309_v32 = vadd.f32 %v308_v30, %v105_v26  ;;  %v130_v24 = vpop.permute.xlu0 %129 }
  0xdf   :  { %1252 = vtanh.f32 %v261_v27  ;;  %v264_v31 = vpop.f32.mrb[4].mxu0 }
  0xe0   :  { %v265_v33 = vadd.f32 %v264_v31, %v70_v7  ;;  %1254 = vtanh.f32 %v307_v29  ;;  %v266_v34 = vpop.f32.mrb[5].mxu0  ;;  %v312_v37 = vpop.f32.mrb[4].mxu1 }
  0xe1   :  { %v267_v36 = vadd.f32 %v266_v34, %v70_v7  ;;  %1256 = vtanh.f32 %v309_v32  ;;  %v313_v38 = vadd.f32 %v312_v37, %v110_v35  ;;  %v314_v39 = vpop.f32.mrb[5].mxu1 }
  0xe2   :  { %1258 = vtanh.f32 %v265_v33  ;;  %v315_v40 = vadd.f32 %v314_v39, %v110_v35 }
  0xe3   :  { %1260 = vtanh.f32 %v267_v36  ;;  %v270_v41 = vpop.f32.mrb[6].mxu0 }
  0xe4   :  { %v1243_v42 = vpop.eup %1242  ;;  %1262 = vtanh.f32 %v313_v38  ;;  %v271_v44 = vadd.f32 %v270_v41, %v75_v9  ;;  %v318_v45 = vpop.f32.mrb[6].mxu1 }
  0xe5   :  { %v1245_v46 = vpop.eup %1244  ;;  %1264 = vtanh.f32 %v315_v40  ;;  %v319_v47 = vadd.f32 %v318_v45, %v115_v43  ;;  %v272_v48 = vpop.f32.mrb[7].mxu0 }
  0xe6   :  { %v320_v49 = vpop.f32.mrb[7].mxu1  ;;  %v1714_v50 = vpop.eup %1246  ;;  %1266 = vtanh.f32 %v271_v44  ;;  %v273_v51 = vadd.f32 %v272_v48, %v75_v9 }
  0xe7   :  { %v321_v52 = vadd.f32 %v320_v49, %v115_v43  ;;  %v1716_v53 = vpop.eup %1248  ;;  %1268 = vtanh.f32 %v319_v47  ;;  %v276_v55 = vpop.f32.mrb[8].mxu0 }
  0xe8   :  { %v1251_v56 = vpop.eup %1250  ;;  %1270 = vtanh.f32 %v273_v51  ;;  %v277_v57 = vadd.f32 %v276_v55, %v1706_v10  ;;  %v324_v58 = vpop.f32.mrb[8].mxu1 }
  0xe9   :  { %v278_v59 = vpop.f32.mrb[9].mxu0  ;;  %v1253_v60 = vpop.eup %1252  ;;  %1272 = vtanh.f32 %v321_v52  ;;  %v325_v61 = vadd.f32 %v324_v58, %v120_v54  ;;  %v1142_v0 = vpack.c.bf16 %v1251_v56, %v1243_v42 }
  0xea   :  { %v279_v62 = vadd.f32 %v278_v59, %v1706_v10  ;;  %v326_v63 = vpop.f32.mrb[9].mxu1  ;;  %v1720_v1 = vpop.eup %1254  ;;  %1274 = vtanh.f32 %v277_v57  ;;  %v1140_v4 = vpack.c.bf16 %v1253_v60, %v1245_v46 }
  0xeb   :  { %v327_v3 = vadd.f32 %v326_v63, %v120_v54  ;;  %v1722_v5 = vpop.eup %1256  ;;  %1276 = vtanh.f32 %v325_v61  ;;  %v282_v7 = vpop.f32.mrb[10].mxu0  ;;  %v1158_v8 = vpack.c.bf16 %v1720_v1, %v1714_v50  ;;  %v381_v50 = vld [vmem:[%s1886_s2 + $0x10] sm:$0xff]  ;;  %v382_v1 = vld [vmem:[%s1886_s2 + $0x18] sm:$0xff] }
  0xec   :  { %v1259_v9 = vpop.eup %1258  ;;  %1278 = vtanh.f32 %v279_v62  ;;  %v283_v14 = vadd.f32 %v282_v7, %v1708_v11  ;;  %v330_v10 = vpop.f32.mrb[10].mxu1  ;;  %1141 = vmatprep.subr.bf16.mxu1 %v1140_v4  ;;  %v1156_v16 = vpack.c.bf16 %v1722_v5, %v1716_v53  ;;  %v380_v53 = vld [vmem:[%s1886_s2 + $0x8] sm:$0xff]  ;;  %v383_v5 = vld [vmem:[%s1886_s2 + $0x20] sm:$0xff] }
  0xed   :  { %v284_v15 = vpop.f32.mrb[11].mxu0  ;;  %v1261_v17 = vpop.eup %1260  ;;  %1280 = vtanh.f32 %v327_v3  ;;  %v331_v18 = vadd.f32 %v330_v10, %v125_v6  ;;  %1143 = vmatpush1.bf16.msra.mxu1 %v1142_v0 }
  0xee   :  { %v285_v19 = vadd.f32 %v284_v15, %v1708_v11  ;;  %v332_v20 = vpop.f32.mrb[11].mxu1  ;;  %v1730_v21 = vpop.eup %1262  ;;  %1282 = vtanh.f32 %v283_v14 }
  0xef   :  { %v333_v22 = vadd.f32 %v332_v20, %v125_v6  ;;  %v1732_v23 = vpop.eup %1264  ;;  %1284 = vtanh.f32 %v331_v18  ;;  %v288_v25 = vpop.f32.mrb[12].mxu0  ;;  %v386_v18 = vld [vmem:[%s1886_s2 + $0x38] sm:$0xff]  ;;  %v388_v20 = vld [vmem:[%s1886_s2 + $0x48] sm:$0xff] }
  0xf0   :  { %v1267_v26 = vpop.eup %1266  ;;  %1286 = vtanh.f32 %v285_v19  ;;  %v289_v27 = vadd.f32 %v288_v25, %v1710_v12  ;;  %v336_v28 = vpop.f32.mrb[12].mxu1  ;;  %v387_v19 = vld [vmem:[%s1886_s2 + $0x40] sm:$0xff]  ;;  %v393_v25 = vld [vmem:[%s1886_s2 + $0x70] sm:$0xff] }
  0xf1   :  { %v290_v29 = vpop.f32.mrb[13].mxu0  ;;  %v1269_v30 = vpop.eup %1268  ;;  %1288 = vtanh.f32 %v333_v22  ;;  %v337_v11 = vadd.f32 %v336_v28, %v130_v24  ;;  %v1146_v33 = vpack.c.bf16 %v1267_v26, %v1259_v9  ;;  %v390_v22 = vld [vmem:[%s1886_s2 + $0x58] sm:$0xff] }
  0xf2   :  { %v291_v31 = vadd.f32 %v290_v29, %v1710_v12  ;;  %v338_v32 = vpop.f32.mrb[13].mxu1  ;;  %v1271_v34 = vpop.eup %1270  ;;  %1290 = vtanh.f32 %v289_v27  ;;  %v1162_v36 = vpack.c.bf16 %v1269_v30, %v1730_v21  ;;  %v389_v21 = vld [vmem:[%s1886_s2 + $0x50] sm:$0xff]  ;;  %v394_v26 = vld [vmem:[%s1886_s2 + $0x78] sm:$0xff] }
  0xf3   :  { %v339_v35 = vadd.f32 %v338_v32, %v130_v24  ;;  %v1273_v37 = vpop.eup %1272  ;;  %v135_v38 = vpop.permute.xlu1 %134  ;;  %1292 = vtanh.f32 %v337_v11  ;;  %v1144_v40 = vpack.c.bf16 %v1271_v34, %v1261_v17  ;;  %v379_v17 = vld [vmem:[%s1886_s2] sm:$0xff]  ;;  %v392_v24 = vld [vmem:[%s1886_s2 + $0x68] sm:$0xff] }
  0xf4   :  { %v294_v39 = vpop.f32.mrb[14].mxu0  ;;  %v1275_v41 = vpop.eup %1274  ;;  %1294 = vtanh.f32 %v291_v31  ;;  %v1160_v12 = vpack.c.bf16 %v1273_v37, %v1732_v23  ;;  %v391_v23 = vld [vmem:[%s1886_s2 + $0x60] sm:$0xff] }
  0xf5   :  { %v295_v42 = vadd.f32 %v294_v39, %v1712_v13  ;;  %v342_v43 = vpop.f32.mrb[14].mxu1  ;;  %v296_v44 = vpop.f32.mrb[15].mxu0  ;;  %1296 = vtanh.f32 %v339_v35  ;;  %1145 = vmatprep.subr.bf16.mxu1 %v1144_v40 }
  0xf6   :  { %v1277_v45 = vpop.eup %1276  ;;  %v343_v46 = vadd.f32 %v342_v43, %v135_v38  ;;  %v297_v47 = vadd.f32 %v296_v44, %v1712_v13  ;;  %v344_v48 = vpop.f32.mrb[15].mxu1  ;;  %1147 = vmatpush1.bf16.msra.mxu1 %v1146_v33 }
  0xf7   :  { %v1279_v49 = vpop.eup %1278  ;;  %1298 = vtanh.f32 %v295_v42  ;;  %v345_v51 = vadd.f32 %v344_v48, %v135_v38  ;;  %v415_v27 = vpop.permute.xlu0 %414 }
  0xf8   :  { %v1281_v52 = vpop.eup %1280  ;;  %1300 = vtanh.f32 %v343_v46  ;;  %v420_v31 = vpop.permute.xlu1 %419 }
  0xf9   :  { %v1283_v54 = vpop.eup %1282  ;;  %1302 = vtanh.f32 %v297_v47 }
  0xfa   :  { %v1285_v55 = vpop.eup %1284  ;;  %1304 = vtanh.f32 %v345_v51  ;;  %v1150_v56 = vpack.c.bf16 %v1283_v54, %v1275_v41 }
  0xfb   :  { %v1287_v57 = vpop.eup %1286  ;;  %v1166_v58 = vpack.c.bf16 %v1285_v55, %v1277_v45 }
  0xfc   :  { %v1289_v59 = vpop.eup %1288  ;;  %v1148_v60 = vpack.c.bf16 %v1287_v57, %v1279_v49  ;;  %v430_v41 = vpop.permute.xlu1 %429 }
  0xfd   :  { %v1291_v61 = vpop.eup %1290  ;;  %v1164_v62 = vpack.c.bf16 %v1289_v59, %v1281_v52 }
  0xfe   :  { %v1293_v13 = vpop.eup %1292  ;;  %1149 = vmatprep.subr.bf16.mxu1 %v1148_v60 }
  0xff   :  { %v1295_v63 = vpop.eup %1294  ;;  %1151 = vmatpush1.bf16.msra.mxu1 %v1150_v56 }
 0x100   :  { %v1297_v0 = vpop.eup %1296 }
 0x101   :  { %v1299_v3 = vpop.eup %1298 }
 0x102   :  { %v1301_v4 = vpop.eup %1300  ;;  %v1154_v6 = vpack.c.bf16 %v1299_v3, %v1291_v61 }
 0x103   :  { %v1303_v7 = vpop.eup %1302  ;;  %v1170_v9 = vpack.c.bf16 %v1301_v4, %v1293_v13 }
 0x104   :  { %v1305_v14 = vpop.eup %1304  ;;  %v1152_v10 = vpack.c.bf16 %v1303_v7, %v1295_v63 }
 0x105   :  { %v1168_v15 = vpack.c.bf16 %v1305_v14, %v1297_v0 }
 0x106   :  { %1153 = vmatprep.subr.bf16.mxu1 %v1152_v10 }
 0x107   :  { %1155 = vmatpush1.bf16.msra.mxu1 %v1154_v6 }
 0x108   :  { %1157 = vmatprep.subr.bf16.mxu1 %v1156_v16  ;;  %v385_v16 = vld [vmem:[%s1886_s2 + $0x30] sm:$0xff] }
 0x10b   :  { %1159 = vmatpush1.bf16.msra.mxu1 %v1158_v8  ;;  %v384_v8 = vld [vmem:[%s1886_s2 + $0x28] sm:$0xff] }
 0x10c   :  { %1161 = vmatprep.subr.bf16.mxu1 %v1160_v12 }
 0x10f   :  { %1163 = vmatpush1.bf16.msra.mxu1 %v1162_v36  ;;  %v425_v36 = vpop.permute.xlu0 %424 }
 0x110   :  { %1165 = vmatprep.subr.bf16.mxu1 %v1164_v62 }
 0x113   :  { %1167 = vmatpush1.bf16.msra.mxu1 %v1166_v58  ;;  %v435_v47 = vpop.permute.xlu0 %434  ;;  %v440_v58 = vpop.permute.xlu1 %439 }
 0x114   :  { %1169 = vmatprep.subr.bf16.mxu1 %v1168_v15 }
 0x117   :  { %1171 = vmatpush1.bf16.msra.mxu1 %v1170_v9  ;;  %v445_v0 = vpop.permute.xlu0 %444 }
 0x11a   :  { %557 = vmatmul.mubr.f32.vlgmr.msra.gmra.mrb[16].mxu1 %v379_v17  ;;  %v450_v17 = vpop.permute.xlu1 %449 }
 0x11b   :  { %562 = vmatprep.mubr.f32.mxu1 %v1434_v2 }
 0x11e   :  { %563 = vmatmul.mubr.f32.gmra.mrb[18].mxu1 %v380_v53 }
 0x11f   :  { %568 = vmatprep.mubr.f32.mxu1 %v1434_v2 }
 0x122   :  { %569 = vmatmul.mubr.f32.gmra.mrb[20].mxu1 %v381_v50 }
 0x123   :  { %574 = vmatprep.mubr.f32.mxu1 %v1434_v2 }
 0x126   :  { %575 = vmatmul.mubr.f32.gmra.mrb[22].mxu1 %v382_v1 }
 0x127   :  { %580 = vmatprep.mubr.f32.mxu1 %v1434_v2 }
 0x12a   :  { %581 = vmatmul.mubr.f32.gmra.mrb[24].mxu1 %v383_v5 }
 0x12b   :  { %586 = vmatprep.mubr.f32.mxu1 %v1434_v2 }
 0x12e   :  { %587 = vmatmul.mubr.f32.gmra.mrb[26].mxu1 %v384_v8 }
 0x12f   :  { %592 = vmatprep.mubr.f32.mxu1 %v1434_v2 }
 0x132   :  { %593 = vmatmul.mubr.f32.gmra.mrb[28].mxu1 %v385_v16 }
 0x133   :  { %598 = vmatprep.mubr.f32.mxu1 %v1434_v2 }
 0x136   :  { %599 = vmatmul.mubr.f32.gmra.mrb[30].mxu1 %v386_v18  ;;  %v455_v18 = vpop.permute.xlu0 %454 }
 0x137   :  { %604 = vmatprep.mubr.f32.mxu1 %v1434_v2 }
 0x13a   :  { %605 = vmatmul.mubr.f32.gmra.mrb[32].mxu1 %v387_v19 }
 0x13b   :  { %610 = vmatprep.mubr.f32.mxu1 %v1434_v2 }
 0x13e   :  { %611 = vmatmul.mubr.f32.gmra.mrb[34].mxu1 %v388_v20 }
 0x13f   :  { %616 = vmatprep.mubr.f32.mxu1 %v1434_v2 }
 0x142   :  { %617 = vmatmul.mubr.f32.gmra.mrb[36].mxu1 %v389_v21 }
 0x143   :  { %622 = vmatprep.mubr.f32.mxu1 %v1434_v2 }
 0x146   :  { %623 = vmatmul.mubr.f32.gmra.mrb[38].mxu1 %v390_v22 }
 0x147   :  { %628 = vmatprep.mubr.f32.mxu1 %v1434_v2 }
 0x14a   :  { %629 = vmatmul.mubr.f32.gmra.mrb[40].mxu1 %v391_v23 }
 0x14b   :  { %634 = vmatprep.mubr.f32.mxu1 %v1434_v2 }
 0x14e   :  { %635 = vmatmul.mubr.f32.gmra.mrb[42].mxu1 %v392_v24 }
 0x14f   :  { %640 = vmatprep.mubr.f32.mxu1 %v1434_v2 }
 0x152   :  { %641 = vmatmul.mubr.f32.gmra.mrb[44].mxu1 %v393_v25 }
 0x153   :  { %646 = vmatprep.mubr.f32.mxu1 %v1434_v2 }
 0x156   :  { %647 = vmatmul.mubr.f32.gmra.mrb[46].mxu1 %v394_v26 }
 0x157   :  { %1063 = vmatprep.mubr.f32.mxu1 %v1434_v2 }
 0x1ed   :  { %v558_v28 = vpop.f32.mrb[16].mxu1 }
 0x1ee   :  { %v559_v29 = vadd.f32 %v558_v28, %v415_v27  ;;  %v560_v30 = vpop.f32.mrb[17].mxu1 }
 0x1ef   :  { %v561_v11 = vadd.f32 %v560_v30, %v415_v27  ;;  %v460_v27 = vpop.permute.xlu1 %459 }
 0x1f0   :  { %1306 = vtanh.f32 %v559_v29 }
 0x1f1   :  { %v564_v32 = vpop.f32.mrb[18].mxu1  ;;  %1308 = vtanh.f32 %v561_v11 }
 0x1f2   :  { %v565_v33 = vadd.f32 %v564_v32, %v420_v31  ;;  %v566_v34 = vpop.f32.mrb[19].mxu1 }
 0x1f3   :  { %v567_v35 = vadd.f32 %v566_v34, %v420_v31 }
 0x1f4   :  { %1310 = vtanh.f32 %v565_v33  ;;  %v465_v33 = vpop.permute.xlu0 %464 }
 0x1f5   :  { %1312 = vtanh.f32 %v567_v35  ;;  %v570_v37 = vpop.f32.mrb[20].mxu1 }
 0x1f6   :  { %v571_v38 = vadd.f32 %v570_v37, %v425_v36  ;;  %v572_v39 = vpop.f32.mrb[21].mxu1 }
 0x1f7   :  { %v573_v40 = vadd.f32 %v572_v39, %v425_v36 }
 0x1f8   :  { %1314 = vtanh.f32 %v571_v38 }
 0x1f9   :  { %v576_v42 = vpop.f32.mrb[22].mxu1  ;;  %1316 = vtanh.f32 %v573_v40 }
 0x1fa   :  { %v577_v43 = vadd.f32 %v576_v42, %v430_v41  ;;  %v578_v44 = vpop.f32.mrb[23].mxu1  ;;  %v1307_v45 = vpop.eup %1306 }
 0x1fb   :  { %v579_v12 = vadd.f32 %v578_v44, %v430_v41  ;;  %v1309_v46 = vpop.eup %1308  ;;  %v470_v42 = vpop.permute.xlu1 %469 }
 0x1fc   :  { %1318 = vtanh.f32 %v577_v43 }
 0x1fd   :  { %1320 = vtanh.f32 %v579_v12  ;;  %v582_v48 = vpop.f32.mrb[24].mxu1 }
 0x1fe   :  { %v1311_v49 = vpop.eup %1310  ;;  %v583_v51 = vadd.f32 %v582_v48, %v435_v47  ;;  %v584_v52 = vpop.f32.mrb[25].mxu1 }
 0x1ff   :  { %v1313_v54 = vpop.eup %1312  ;;  %v585_v55 = vadd.f32 %v584_v52, %v435_v47  ;;  %v1174_v56 = vpack.c.bf16 %v1311_v49, %v1307_v45  ;;  %v475_v48 = vpop.permute.xlu0 %474 }
 0x200   :  { %v1172_v57 = vpack.c.bf16 %v1313_v54, %v1309_v46  ;;  %1322 = vtanh.f32 %v583_v51 }
 0x201   :  { %v588_v59 = vpop.f32.mrb[26].mxu1  ;;  %1324 = vtanh.f32 %v585_v55 }
 0x202   :  { %v589_v60 = vadd.f32 %v588_v59, %v440_v58  ;;  %v590_v61 = vpop.f32.mrb[27].mxu1  ;;  %1173 = vmatprep.subr.bf16.mxu0 %v1172_v57  ;;  %v1315_v13 = vpop.eup %1314 }
 0x203   :  { %v591_v62 = vadd.f32 %v590_v61, %v440_v58  ;;  %1175 = vmatpush1.bf16.msra.mxu0 %v1174_v56  ;;  %v1317_v63 = vpop.eup %1316  ;;  %v480_v59 = vpop.permute.xlu1 %479 }
 0x204   :  { %1326 = vtanh.f32 %v589_v60 }
 0x205   :  { %1328 = vtanh.f32 %v591_v62  ;;  %v594_v3 = vpop.f32.mrb[28].mxu1 }
 0x206   :  { %v1319_v4 = vpop.eup %1318  ;;  %v595_v6 = vadd.f32 %v594_v3, %v445_v0  ;;  %v596_v7 = vpop.f32.mrb[29].mxu1 }
 0x207   :  { %v1321_v9 = vpop.eup %1320  ;;  %v597_v14 = vadd.f32 %v596_v7, %v445_v0  ;;  %v1178_v10 = vpack.c.bf16 %v1319_v4, %v1315_v13  ;;  %v485_v3 = vpop.permute.xlu0 %484 }
 0x208   :  { %v1176_v15 = vpack.c.bf16 %v1321_v9, %v1317_v63  ;;  %1330 = vtanh.f32 %v595_v6 }
 0x209   :  { %v600_v53 = vpop.f32.mrb[30].mxu1  ;;  %1332 = vtanh.f32 %v597_v14 }
 0x20a   :  { %v601_v50 = vadd.f32 %v600_v53, %v450_v17  ;;  %v602_v1 = vpop.f32.mrb[31].mxu1  ;;  %1177 = vmatprep.subr.bf16.mxu0 %v1176_v15  ;;  %v1323_v8 = vpop.eup %1322 }
 0x20b   :  { %v603_v5 = vadd.f32 %v602_v1, %v450_v17  ;;  %1179 = vmatpush1.bf16.msra.mxu0 %v1178_v10  ;;  %v1325_v16 = vpop.eup %1324  ;;  %v490_v53 = vpop.permute.xlu1 %489 }
 0x20c   :  { %1334 = vtanh.f32 %v601_v50 }
 0x20d   :  { %1336 = vtanh.f32 %v603_v5  ;;  %v606_v19 = vpop.f32.mrb[32].mxu1 }
 0x20e   :  { %v1327_v20 = vpop.eup %1326  ;;  %v607_v21 = vadd.f32 %v606_v19, %v455_v18  ;;  %v608_v22 = vpop.f32.mrb[33].mxu1 }
 0x20f   :  { %v1329_v23 = vpop.eup %1328  ;;  %v609_v24 = vadd.f32 %v608_v22, %v455_v18  ;;  %v1182_v25 = vpack.c.bf16 %v1327_v20, %v1323_v8 }
 0x210   :  { %v1180_v26 = vpack.c.bf16 %v1329_v23, %v1325_v16  ;;  %1338 = vtanh.f32 %v607_v21 }
 0x211   :  { %v612_v28 = vpop.f32.mrb[34].mxu1  ;;  %1340 = vtanh.f32 %v609_v24 }
 0x212   :  { %v613_v29 = vadd.f32 %v612_v28, %v460_v27  ;;  %v614_v30 = vpop.f32.mrb[35].mxu1  ;;  %1181 = vmatprep.subr.bf16.mxu0 %v1180_v26  ;;  %v1331_v31 = vpop.eup %1330 }
 0x213   :  { %v615_v11 = vadd.f32 %v614_v30, %v460_v27  ;;  %1183 = vmatpush1.bf16.msra.mxu0 %v1182_v25  ;;  %v1333_v32 = vpop.eup %1332  ;;  %v1109_v30 = vld [vmem:[%s1886_s2 + $0x88] sm:$0xff] }
 0x214   :  { %1342 = vtanh.f32 %v613_v29  ;;  %v1108_v29 = vld [vmem:[%s1886_s2 + $0x80] sm:$0xff] }
 0x215   :  { %1344 = vtanh.f32 %v615_v11  ;;  %v618_v34 = vpop.f32.mrb[36].mxu1  ;;  %v1110_v11 = vld [vmem:[%s1886_s2 + $0x90] sm:$0xff] }
 0x216   :  { %v1335_v35 = vpop.eup %1334  ;;  %v619_v36 = vadd.f32 %v618_v34, %v465_v33  ;;  %v620_v37 = vpop.f32.mrb[37].mxu1  ;;  %v1114_v34 = vld [vmem:[%s1886_s2 + $0xb0] sm:$0xff] }
 0x217   :  { %v1337_v38 = vpop.eup %1336  ;;  %v621_v39 = vadd.f32 %v620_v37, %v465_v33  ;;  %v1186_v40 = vpack.c.bf16 %v1335_v35, %v1331_v31  ;;  %v1111_v31 = vld [vmem:[%s1886_s2 + $0x98] sm:$0xff]  ;;  %v1113_v33 = vld [vmem:[%s1886_s2 + $0xa8] sm:$0xff] }
 0x218   :  { %v1184_v41 = vpack.c.bf16 %v1337_v38, %v1333_v32  ;;  %1346 = vtanh.f32 %v619_v36  ;;  %v1112_v32 = vld [vmem:[%s1886_s2 + $0xa0] sm:$0xff]  ;;  %v1115_v35 = vld [vmem:[%s1886_s2 + $0xb8] sm:$0xff]  ;;  %v1117_v37 = vld [vmem:[%s1886_s2 + $0xc8] sm:$0xff] }
 0x219   :  { %v624_v43 = vpop.f32.mrb[38].mxu1  ;;  %1348 = vtanh.f32 %v621_v39  ;;  %v1116_v36 = vld [vmem:[%s1886_s2 + $0xc0] sm:$0xff]  ;;  %v1118_v38 = vld [vmem:[%s1886_s2 + $0xd0] sm:$0xff]  ;;  %v1119_v39 = vld [vmem:[%s1886_s2 + $0xd8] sm:$0xff] }
 0x21a   :  { %v625_v44 = vadd.f32 %v624_v43, %v470_v42  ;;  %v626_v12 = vpop.f32.mrb[39].mxu1  ;;  %1185 = vmatprep.subr.bf16.mxu0 %v1184_v41  ;;  %v1339_v46 = vpop.eup %1338  ;;  %v1121_v41 = vld [vmem:[%s1886_s2 + $0xe8] sm:$0xff]  ;;  %v1123_v43 = vld [vmem:[%s1886_s2 + $0xf8] sm:$0xff] }
 0x21b   :  { %v627_v45 = vadd.f32 %v626_v12, %v470_v42  ;;  %1187 = vmatpush1.bf16.msra.mxu0 %v1186_v40  ;;  %v1341_v47 = vpop.eup %1340  ;;  %v1120_v40 = vld [vmem:[%s1886_s2 + $0xe0] sm:$0xff]  ;;  %v1122_v42 = vld [vmem:[%s1886_s2 + $0xf0] sm:$0xff] }
 0x21c   :  { %1350 = vtanh.f32 %v625_v44  ;;  %v722_v44 = vpop.permute.xlu0 %721 }
 0x21d   :  { %1352 = vtanh.f32 %v627_v45  ;;  %v630_v49 = vpop.f32.mrb[40].mxu1 }
 0x21e   :  { %v1343_v51 = vpop.eup %1342  ;;  %v631_v52 = vadd.f32 %v630_v49, %v475_v48  ;;  %v632_v54 = vpop.f32.mrb[41].mxu1 }
 0x21f   :  { %v1345_v55 = vpop.eup %1344  ;;  %v633_v56 = vadd.f32 %v632_v54, %v475_v48  ;;  %v1190_v57 = vpack.c.bf16 %v1343_v51, %v1339_v46  ;;  %v727_v48 = vpop.permute.xlu1 %726 }
 0x220   :  { %v1188_v58 = vpack.c.bf16 %v1345_v55, %v1341_v47  ;;  %1354 = vtanh.f32 %v631_v52  ;;  %v732_v55 = vpop.permute.xlu0 %731 }
 0x221   :  { %v636_v60 = vpop.f32.mrb[42].mxu1  ;;  %1356 = vtanh.f32 %v633_v56 }
 0x222   :  { %v637_v61 = vadd.f32 %v636_v60, %v480_v59  ;;  %v638_v62 = vpop.f32.mrb[43].mxu1  ;;  %1189 = vmatprep.subr.bf16.mxu0 %v1188_v58  ;;  %v1347_v63 = vpop.eup %1346 }
 0x223   :  { %v639_v13 = vadd.f32 %v638_v62, %v480_v59  ;;  %1191 = vmatpush1.bf16.msra.mxu0 %v1190_v57  ;;  %v1349_v0 = vpop.eup %1348  ;;  %v737_v59 = vpop.permute.xlu1 %736 }
 0x224   :  { %1358 = vtanh.f32 %v637_v61 }
 0x225   :  { %1360 = vtanh.f32 %v639_v13  ;;  %v642_v4 = vpop.f32.mrb[44].mxu1 }
 0x226   :  { %v1351_v6 = vpop.eup %1350  ;;  %v643_v7 = vadd.f32 %v642_v4, %v485_v3  ;;  %v644_v9 = vpop.f32.mrb[45].mxu1 }
 0x227   :  { %v1353_v14 = vpop.eup %1352  ;;  %v645_v10 = vadd.f32 %v644_v9, %v485_v3  ;;  %v1194_v15 = vpack.c.bf16 %v1351_v6, %v1347_v63  ;;  %v742_v3 = vpop.permute.xlu0 %741 }
 0x228   :  { %v1192_v17 = vpack.c.bf16 %v1353_v14, %v1349_v0  ;;  %1362 = vtanh.f32 %v643_v7 }
 0x229   :  { %v648_v50 = vpop.f32.mrb[46].mxu1  ;;  %1364 = vtanh.f32 %v645_v10 }
 0x22a   :  { %v649_v1 = vadd.f32 %v648_v50, %v490_v53  ;;  %v650_v5 = vpop.f32.mrb[47].mxu1  ;;  %1193 = vmatprep.subr.bf16.mxu0 %v1192_v17  ;;  %v1355_v16 = vpop.eup %1354 }
 0x22b   :  { %v651_v8 = vadd.f32 %v650_v5, %v490_v53  ;;  %1195 = vmatpush1.bf16.msra.mxu0 %v1194_v15  ;;  %v1357_v18 = vpop.eup %1356  ;;  %v747_v53 = vpop.permute.xlu1 %746 }
 0x22c   :  { %1366 = vtanh.f32 %v649_v1 }
 0x22d   :  { %1368 = vtanh.f32 %v651_v8 }
 0x22e   :  { %v1359_v19 = vpop.eup %1358 }
 0x22f   :  { %v1361_v20 = vpop.eup %1360  ;;  %v1198_v21 = vpack.c.bf16 %v1359_v19, %v1355_v16  ;;  %v752_v19 = vpop.permute.xlu0 %751 }
 0x230   :  { %v1196_v22 = vpack.c.bf16 %v1361_v20, %v1357_v18 }
 0x232   :  { %1197 = vmatprep.subr.bf16.mxu0 %v1196_v22  ;;  %v1363_v23 = vpop.eup %1362 }
 0x233   :  { %1199 = vmatpush1.bf16.msra.mxu0 %v1198_v21  ;;  %v1365_v24 = vpop.eup %1364 }
 0x236   :  { %v1367_v25 = vpop.eup %1366 }
 0x237   :  { %v1369_v26 = vpop.eup %1368  ;;  %v1202_v27 = vpack.c.bf16 %v1367_v25, %v1363_v23 }
 0x238   :  { %v1200_v28 = vpack.c.bf16 %v1369_v26, %v1365_v24 }
 0x23a   :  { %1201 = vmatprep.subr.bf16.mxu0 %v1200_v28  ;;  %v757_v28 = vpop.permute.xlu1 %756 }
 0x23b   :  { %1203 = vmatpush1.bf16.msra.mxu0 %v1202_v27 }
 0x23e   :  { %864 = vmatmul.mubr.f32.vlgmr.msra.gmra.mrb[16].mxu0 %v1108_v29 }
 0x23f   :  { %869 = vmatprep.mubr.f32.mxu0 %v1434_v2 }
 0x242   :  { %870 = vmatmul.mubr.f32.gmra.mrb[18].mxu0 %v1109_v30 }
 0x243   :  { %875 = vmatprep.mubr.f32.mxu0 %v1434_v2 }
 0x246   :  { %876 = vmatmul.mubr.f32.gmra.mrb[20].mxu0 %v1110_v11 }
 0x247   :  { %881 = vmatprep.mubr.f32.mxu0 %v1434_v2 }
 0x24a   :  { %882 = vmatmul.mubr.f32.gmra.mrb[22].mxu0 %v1111_v31 }
 0x24b   :  { %887 = vmatprep.mubr.f32.mxu0 %v1434_v2 }
 0x24e   :  { %888 = vmatmul.mubr.f32.gmra.mrb[24].mxu0 %v1112_v32 }
 0x24f   :  { %893 = vmatprep.mubr.f32.mxu0 %v1434_v2 }
 0x252   :  { %894 = vmatmul.mubr.f32.gmra.mrb[26].mxu0 %v1113_v33 }
 0x253   :  { %899 = vmatprep.mubr.f32.mxu0 %v1434_v2 }
 0x256   :  { %900 = vmatmul.mubr.f32.gmra.mrb[28].mxu0 %v1114_v34  ;;  %v762_v34 = vpop.permute.xlu0 %761 }
 0x257   :  { %905 = vmatprep.mubr.f32.mxu0 %v1434_v2 }
 0x25a   :  { %906 = vmatmul.mubr.f32.gmra.mrb[30].mxu0 %v1115_v35 }
 0x25b   :  { %911 = vmatprep.mubr.f32.mxu0 %v1434_v2 }
 0x25e   :  { %912 = vmatmul.mubr.f32.gmra.mrb[32].mxu0 %v1116_v36 }
 0x25f   :  { %917 = vmatprep.mubr.f32.mxu0 %v1434_v2 }
 0x262   :  { %918 = vmatmul.mubr.f32.gmra.mrb[34].mxu0 %v1117_v37 }
 0x263   :  { %923 = vmatprep.mubr.f32.mxu0 %v1434_v2 }
 0x266   :  { %924 = vmatmul.mubr.f32.gmra.mrb[36].mxu0 %v1118_v38 }
 0x267   :  { %929 = vmatprep.mubr.f32.mxu0 %v1434_v2 }
 0x26a   :  { %930 = vmatmul.mubr.f32.gmra.mrb[38].mxu0 %v1119_v39 }
 0x26b   :  { %935 = vmatprep.mubr.f32.mxu0 %v1434_v2 }
 0x26e   :  { %936 = vmatmul.mubr.f32.gmra.mrb[40].mxu0 %v1120_v40 }
 0x26f   :  { %941 = vmatprep.mubr.f32.mxu0 %v1434_v2 }
 0x272   :  { %942 = vmatmul.mubr.f32.gmra.mrb[42].mxu0 %v1121_v41 }
 0x273   :  { %947 = vmatprep.mubr.f32.mxu0 %v1434_v2 }
 0x276   :  { %948 = vmatmul.mubr.f32.gmra.mrb[44].mxu0 %v1122_v42 }
 0x277   :  { %953 = vmatprep.mubr.f32.mxu0 %v1434_v2 }
 0x27a   :  { %954 = vmatmul.mubr.f32.gmra.mrb[46].mxu0 %v1123_v43  ;;  %v767_v43 = vpop.permute.xlu1 %766 }
 0x311   :  { %v865_v12 = vpop.f32.mrb[16].mxu0 }
 0x312   :  { %v866_v45 = vadd.f32 %v865_v12, %v722_v44  ;;  %v867_v46 = vpop.f32.mrb[17].mxu0 }
 0x313   :  { %v868_v47 = vadd.f32 %v867_v46, %v722_v44 }
 0x314   :  { %1370 = vtanh.f32 %v866_v45 }
 0x315   :  { %v871_v49 = vpop.f32.mrb[18].mxu0  ;;  %1372 = vtanh.f32 %v868_v47 }
 0x316   :  { %v872_v51 = vadd.f32 %v871_v49, %v727_v48  ;;  %v873_v52 = vpop.f32.mrb[19].mxu0  ;;  %v772_v49 = vpop.permute.xlu0 %771 }
 0x317   :  { %v874_v54 = vadd.f32 %v873_v52, %v727_v48 }
 0x318   :  { %1374 = vtanh.f32 %v872_v51 }
 0x319   :  { %1376 = vtanh.f32 %v874_v54  ;;  %v877_v2 = vpop.f32.mrb[20].mxu0 }
 0x31a   :  { %v878_v56 = vadd.f32 %v877_v2, %v732_v55  ;;  %v879_v57 = vpop.f32.mrb[21].mxu0 }
 0x31b   :  { %v880_v58 = vadd.f32 %v879_v57, %v732_v55 }
 0x31c   :  { %1378 = vtanh.f32 %v878_v56 }
 0x31d   :  { %v883_v60 = vpop.f32.mrb[22].mxu0  ;;  %1380 = vtanh.f32 %v880_v58 }
 0x31e   :  { %v884_v61 = vadd.f32 %v883_v60, %v737_v59  ;;  %v885_v62 = vpop.f32.mrb[23].mxu0  ;;  %v1371_v63 = vpop.eup %1370 }
 0x31f   :  { %v886_v13 = vadd.f32 %v885_v62, %v737_v59  ;;  %v1373_v0 = vpop.eup %1372  ;;  %v777_v59 = vpop.permute.xlu1 %776 }
 0x320   :  { %1382 = vtanh.f32 %v884_v61 }
 0x321   :  { %1384 = vtanh.f32 %v886_v13  ;;  %v889_v4 = vpop.f32.mrb[24].mxu0 }
 0x322   :  { %v1375_v6 = vpop.eup %1374  ;;  %v890_v7 = vadd.f32 %v889_v4, %v742_v3  ;;  %v891_v9 = vpop.f32.mrb[25].mxu0 }
 0x323   :  { %v1377_v14 = vpop.eup %1376  ;;  %v892_v10 = vadd.f32 %v891_v9, %v742_v3  ;;  %v1206_v15 = vpack.c.bf16 %v1375_v6, %v1371_v63  ;;  %v782_v3 = vpop.permute.xlu0 %781 }
 0x324   :  { %v1204_v17 = vpack.c.bf16 %v1377_v14, %v1373_v0  ;;  %1386 = vtanh.f32 %v890_v7 }
 0x325   :  { %v895_v50 = vpop.f32.mrb[26].mxu0  ;;  %1388 = vtanh.f32 %v892_v10 }
 0x326   :  { %v896_v1 = vadd.f32 %v895_v50, %v747_v53  ;;  %v897_v5 = vpop.f32.mrb[27].mxu0  ;;  %1205 = vmatprep.subr.bf16.mxu1 %v1204_v17  ;;  %v1379_v16 = vpop.eup %1378 }
 0x327   :  { %v898_v8 = vadd.f32 %v897_v5, %v747_v53  ;;  %1207 = vmatpush1.bf16.msra.mxu1 %v1206_v15  ;;  %v1381_v18 = vpop.eup %1380  ;;  %v787_v53 = vpop.permute.xlu1 %786 }
 0x328   :  { %1390 = vtanh.f32 %v896_v1 }
 0x329   :  { %1392 = vtanh.f32 %v898_v8  ;;  %v901_v20 = vpop.f32.mrb[28].mxu0 }
 0x32a   :  { %v1383_v21 = vpop.eup %1382  ;;  %v902_v22 = vadd.f32 %v901_v20, %v752_v19  ;;  %v903_v23 = vpop.f32.mrb[29].mxu0 }
 0x32b   :  { %v1385_v24 = vpop.eup %1384  ;;  %v904_v25 = vadd.f32 %v903_v23, %v752_v19  ;;  %v1210_v26 = vpack.c.bf16 %v1383_v21, %v1379_v16  ;;  %v792_v19 = vpop.permute.xlu0 %791 }
 0x32c   :  { %v1208_v27 = vpack.c.bf16 %v1385_v24, %v1381_v18  ;;  %1394 = vtanh.f32 %v902_v22 }
 0x32d   :  { %v907_v29 = vpop.f32.mrb[30].mxu0  ;;  %1396 = vtanh.f32 %v904_v25 }
 0x32e   :  { %v908_v30 = vadd.f32 %v907_v29, %v757_v28  ;;  %v909_v11 = vpop.f32.mrb[31].mxu0  ;;  %1209 = vmatprep.subr.bf16.mxu1 %v1208_v27  ;;  %v1387_v32 = vpop.eup %1386 }
 0x32f   :  { %v910_v31 = vadd.f32 %v909_v11, %v757_v28  ;;  %1211 = vmatpush1.bf16.msra.mxu1 %v1210_v26  ;;  %v1389_v33 = vpop.eup %1388  ;;  %v797_v28 = vpop.permute.xlu1 %796 }
 0x330   :  { %1398 = vtanh.f32 %v908_v30 }
 0x331   :  { %1400 = vtanh.f32 %v910_v31  ;;  %v913_v35 = vpop.f32.mrb[32].mxu0 }
 0x332   :  { %v1391_v36 = vpop.eup %1390  ;;  %v914_v37 = vadd.f32 %v913_v35, %v762_v34  ;;  %v915_v38 = vpop.f32.mrb[33].mxu0 }
 0x333   :  { %v1393_v39 = vpop.eup %1392  ;;  %v916_v40 = vadd.f32 %v915_v38, %v762_v34  ;;  %v1214_v41 = vpack.c.bf16 %v1391_v36, %v1387_v32 }
 0x334   :  { %v1212_v42 = vpack.c.bf16 %v1393_v39, %v1389_v33  ;;  %1402 = vtanh.f32 %v914_v37 }
 0x335   :  { %v919_v44 = vpop.f32.mrb[34].mxu0  ;;  %1404 = vtanh.f32 %v916_v40 }
 0x336   :  { %v920_v12 = vadd.f32 %v919_v44, %v767_v43  ;;  %v921_v45 = vpop.f32.mrb[35].mxu0  ;;  %1213 = vmatprep.subr.bf16.mxu1 %v1212_v42  ;;  %v1395_v47 = vpop.eup %1394  ;;  %v992_v44 = vld [vmem:[%s1887_s3] sm:$0xff] }
 0x337   :  { %v922_v46 = vadd.f32 %v921_v45, %v767_v43  ;;  %1215 = vmatpush1.bf16.msra.mxu1 %v1214_v41  ;;  %v1397_v48 = vpop.eup %1396 }
 0x338   :  { %1406 = vtanh.f32 %v920_v12  ;;  %v997_v12 = vpop.permute.xlu0 %996 }
 0x339   :  { %1408 = vtanh.f32 %v922_v46  ;;  %v925_v51 = vpop.f32.mrb[36].mxu0 }
 0x33a   :  { %v1399_v52 = vpop.eup %1398  ;;  %v926_v54 = vadd.f32 %v925_v51, %v772_v49  ;;  %v927_v55 = vpop.f32.mrb[37].mxu0 }
 0x33b   :  { %v1401_v2 = vpop.eup %1400  ;;  %v928_v56 = vadd.f32 %v927_v55, %v772_v49  ;;  %v1218_v57 = vpack.c.bf16 %v1399_v52, %v1395_v47 }
 0x33c   :  { %v1216_v58 = vpack.c.bf16 %v1401_v2, %v1397_v48  ;;  %1410 = vtanh.f32 %v926_v54 }
 0x33d   :  { %v931_v60 = vpop.f32.mrb[38].mxu0  ;;  %1412 = vtanh.f32 %v928_v56 }
 0x33e   :  { %v932_v61 = vadd.f32 %v931_v60, %v777_v59  ;;  %v933_v62 = vpop.f32.mrb[39].mxu0  ;;  %1217 = vmatprep.subr.bf16.mxu1 %v1216_v58  ;;  %v1403_v63 = vpop.eup %1402 }
 0x33f   :  { %v934_v13 = vadd.f32 %v933_v62, %v777_v59  ;;  %1219 = vmatpush1.bf16.msra.mxu1 %v1218_v57  ;;  %v1405_v0 = vpop.eup %1404 }
 0x340   :  { %1414 = vtanh.f32 %v932_v61 }
 0x341   :  { %1416 = vtanh.f32 %v934_v13  ;;  %v937_v4 = vpop.f32.mrb[40].mxu0 }
 0x342   :  { %v1407_v6 = vpop.eup %1406  ;;  %v938_v7 = vadd.f32 %v937_v4, %v782_v3  ;;  %v939_v9 = vpop.f32.mrb[41].mxu0 }
 0x343   :  { %v1409_v14 = vpop.eup %1408  ;;  %v940_v10 = vadd.f32 %v939_v9, %v782_v3  ;;  %v1222_v15 = vpack.c.bf16 %v1407_v6, %v1403_v63 }
 0x344   :  { %v1220_v17 = vpack.c.bf16 %v1409_v14, %v1405_v0  ;;  %1418 = vtanh.f32 %v938_v7 }
 0x345   :  { %v943_v50 = vpop.f32.mrb[42].mxu0  ;;  %1420 = vtanh.f32 %v940_v10 }
 0x346   :  { %v944_v1 = vadd.f32 %v943_v50, %v787_v53  ;;  %v945_v5 = vpop.f32.mrb[43].mxu0  ;;  %1221 = vmatprep.subr.bf16.mxu1 %v1220_v17  ;;  %v1411_v16 = vpop.eup %1410 }
 0x347   :  { %v946_v8 = vadd.f32 %v945_v5, %v787_v53  ;;  %1223 = vmatpush1.bf16.msra.mxu1 %v1222_v15  ;;  %v1413_v18 = vpop.eup %1412 }
 0x348   :  { %1422 = vtanh.f32 %v944_v1 }
 0x349   :  { %1424 = vtanh.f32 %v946_v8  ;;  %v949_v20 = vpop.f32.mrb[44].mxu0 }
 0x34a   :  { %v1415_v21 = vpop.eup %1414  ;;  %v950_v22 = vadd.f32 %v949_v20, %v792_v19  ;;  %v951_v23 = vpop.f32.mrb[45].mxu0 }
 0x34b   :  { %v1417_v24 = vpop.eup %1416  ;;  %v952_v25 = vadd.f32 %v951_v23, %v792_v19  ;;  %v1226_v26 = vpack.c.bf16 %v1415_v21, %v1411_v16 }
 0x34c   :  { %v1224_v27 = vpack.c.bf16 %v1417_v24, %v1413_v18  ;;  %1426 = vtanh.f32 %v950_v22 }
 0x34d   :  { %v955_v29 = vpop.f32.mrb[46].mxu0  ;;  %1428 = vtanh.f32 %v952_v25 }
 0x34e   :  { %v956_v30 = vadd.f32 %v955_v29, %v797_v28  ;;  %v957_v11 = vpop.f32.mrb[47].mxu0  ;;  %1225 = vmatprep.subr.bf16.mxu1 %v1224_v27  ;;  %v1419_v32 = vpop.eup %1418 }
 0x34f   :  { %v958_v31 = vadd.f32 %v957_v11, %v797_v28  ;;  %1227 = vmatpush1.bf16.msra.mxu1 %v1226_v26  ;;  %v1421_v33 = vpop.eup %1420 }
 0x350   :  { %1430 = vtanh.f32 %v956_v30 }
 0x351   :  { %1432 = vtanh.f32 %v958_v31 }
 0x352   :  { %v1423_v34 = vpop.eup %1422 }
 0x353   :  { %v1425_v35 = vpop.eup %1424  ;;  %v1230_v36 = vpack.c.bf16 %v1423_v34, %v1419_v32 }
 0x354   :  { %v1228_v37 = vpack.c.bf16 %v1425_v35, %v1421_v33 }
 0x356   :  { %1229 = vmatprep.subr.bf16.mxu1 %v1228_v37  ;;  %v1427_v38 = vpop.eup %1426 }
 0x357   :  { %1231 = vmatpush1.bf16.msra.mxu1 %v1230_v36  ;;  %v1429_v39 = vpop.eup %1428 }
 0x35a   :  { %v1431_v40 = vpop.eup %1430 }
 0x35b   :  { %v1433_v41 = vpop.eup %1432  ;;  %v1234_v42 = vpack.c.bf16 %v1431_v40, %v1427_v38 }
 0x35c   :  { %v1232_v43 = vpack.c.bf16 %v1433_v41, %v1429_v39 }
 0x35e   :  { %1233 = vmatprep.subr.bf16.mxu1 %v1232_v43 }
 0x35f   :  { %1235 = vmatpush1.bf16.msra.mxu1 %v1234_v42 }
 0x362   :  { %1064 = vmatmul.mubr.f32.vlgmr.msra.gmra.mrb[48].mxu1 %v992_v44 }
 0x435   :  { %v1065_v45 = vpop.f32.mrb[48].mxu1 }
 0x436   :  { %v1066_v46 = vadd.f32 %v1065_v45, %v997_v12  ;;  %v1067_v47 = vpop.f32.mrb[49].mxu1 }
 0x437   :  { %v1068_v48 = vadd.f32 %v1067_v47, %v997_v12 }
 0x438   :  { %1070 = vst [vmem:[%s1888_s6] sm:$0xff] %v1066_v46 }
 0x439   :  { %1071 = vst [vmem:[%s1888_s6 + $0x8] sm:$0xff] %v1068_v48 }

</bundles_post_ra>
